<compile_context>
chip_gen: v5e
topology: v5e:2x2
jax: 0.10.0
libtpu: 0.0.40
codegen_flags: <defaults>
</compile_context>

<pallas_src>
import jax
import jax.numpy as jnp
from jax.experimental import pallas as pl
from jax.experimental.pallas import tpu as pltpu


def node_head_kernel(x_ref, w_ref, b_ref, o_ref):
    # x_ref: (TB, H) VMEM   w_ref: (1, H) VMEM   b_ref: (1, 1) SMEM   o_ref: (TB, 1) VMEM
    x = x_ref[...]                                   # (TB, H)
    w = w_ref[...]                                   # (1, H) — broadcasts over rows
    # y = sum_h x[:, h] * w[0, h]   (VPU multiply + cross-lane reduce; MXU not used
    # since the output has a single column).
    y = jnp.sum(x * w, axis=-1, keepdims=True)       # (TB, 1), f32
    o_ref[...] = (y + b_ref[0, 0]).astype(o_ref.dtype)


def node_head_forward(ht, weight, bias, *, block_b=512):
    """ht: (B, H) f32, weight: (1, H) f32, bias: (1,) f32 -> (B, 1) f32."""
    B, H = ht.shape
    b2d = bias.reshape(1, 1)

    if B <= block_b:
        # Small batch: one full-array block, no grid — minimal-overhead form.
        return pl.pallas_call(
            node_head_kernel,
            out_shape=jax.ShapeDtypeStruct((B, 1), ht.dtype),
            in_specs=[
                pl.BlockSpec(memory_space=pltpu.VMEM),   # ht, full array
                pl.BlockSpec(memory_space=pltpu.VMEM),   # weight, full array
                pl.BlockSpec(memory_space=pltpu.SMEM),   # bias scalar in SMEM
            ],
            out_specs=pl.BlockSpec(memory_space=pltpu.VMEM),
        )(ht, weight, b2d)

    # Large batch: tile over B; batch axis is embarrassingly parallel
    # ("parallel" lets Mosaic shard grid steps across v7x's two TensorCores).
    tb = block_b
    return pl.pallas_call(
        node_head_kernel,
        out_shape=jax.ShapeDtypeStruct((B, 1), ht.dtype),
        grid=(pl.cdiv(B, tb),),
        in_specs=[
            pl.BlockSpec((tb, H), lambda i: (i, 0)),     # batch tile of ht
            pl.BlockSpec((1, H), lambda i: (0, 0)),      # weight, resident
            pl.BlockSpec(memory_space=pltpu.SMEM),       # bias scalar in SMEM
        ],
        out_specs=pl.BlockSpec((tb, 1), lambda i: (i, 0)),
        compiler_params=pltpu.CompilerParams(
            dimension_semantics=("parallel",)
        ),
    )(ht, weight, b2d)


if __name__ == "__main__":
    # Deterministic parameter / input construction (synthetic, no checkpoint).
    lstm_hidden_size = 32
    batch = 8

    key = jax.random.PRNGKey(0)
    k_x, k_w, k_b, k_x2 = jax.random.split(key, 4)

    ht = jax.random.normal(k_x, (batch, lstm_hidden_size), dtype=jnp.float32)
    # nn.Linear default init: U(-1/sqrt(H), 1/sqrt(H)) — emulate deterministically.
    bound = 1.0 / (lstm_hidden_size ** 0.5)
    weight = jax.random.uniform(
        k_w, (1, lstm_hidden_size), minval=-bound, maxval=bound, dtype=jnp.float32
    )
    bias = jax.random.uniform(k_b, (1,), minval=-bound, maxval=bound, dtype=jnp.float32)

    # Small-batch (gridless) path — matches the PyTorch module's shapes.
    out = jax.block_until_ready(node_head_forward(ht, weight, bias))
    ref = ht @ weight.T + bias
    assert out.shape == (batch, 1)
    assert jnp.allclose(out, ref, atol=1e-5, rtol=1e-5)

    # Also exercise the batch-tiled (parallel-grid) path at a larger B.
    big_b = 2048
    ht_big = jax.random.normal(k_x2, (big_b, lstm_hidden_size), dtype=jnp.float32)
    out_big = jax.block_until_ready(node_head_forward(ht_big, weight, bias, block_b=512))
    ref_big = ht_big @ weight.T + bias
    assert out_big.shape == (big_b, 1)
    assert jnp.allclose(out_big, ref_big, atol=1e-5, rtol=1e-5)

    print("KERNEL_OK")
</pallas_src>

<mosaic_0001>
module attributes {stable_mosaic.version = 11 : i64} {
  func.func @node_head_kernel(%arg0: memref<8x32xf32, #tpu.memory_space<vmem>>, %arg1: memref<1x32xf32, #tpu.memory_space<vmem>>, %arg2: memref<1x1xf32, #tpu.memory_space<smem>>, %arg3: memref<8x1xf32, #tpu.memory_space<vmem>>) attributes {dimension_semantics = [], scalar_prefetch = 0 : i64, scratch_operands = 0 : i64, tpu.core_type = #tpu.core_type<tc>} {
    %c0 = arith.constant 0 : index
    %c0_0 = arith.constant 0 : index
    %0 = vector.load %arg0[%c0, %c0_0] : memref<8x32xf32, #tpu.memory_space<vmem>>, vector<8x32xf32>
    %c0_1 = arith.constant 0 : index
    %c0_2 = arith.constant 0 : index
    %1 = vector.load %arg1[%c0_1, %c0_2] : memref<1x32xf32, #tpu.memory_space<vmem>>, vector<1x32xf32>
    %2 = vector.broadcast %1 : vector<1x32xf32> to vector<8x32xf32>
    %3 = arith.mulf %0, %2 : vector<8x32xf32>
    %cst = arith.constant dense<0.000000e+00> : vector<8xf32>
    %4 = vector.multi_reduction <add>, %3, %cst [1] : vector<8x32xf32> to vector<8xf32>
    %5 = vector.shape_cast %4 : vector<8xf32> to vector<8x1xf32>
    %c0_3 = arith.constant 0 : index
    %c0_4 = arith.constant 0 : index
    %6 = memref.load %arg2[%c0_3, %c0_4] : memref<1x1xf32, #tpu.memory_space<smem>>
    %7 = vector.broadcast %6 : f32 to vector<8x1xf32>
    %8 = arith.addf %5, %7 : vector<8x1xf32>
    %c0_5 = arith.constant 0 : index
    %c0_6 = arith.constant 0 : index
    %9 = vector.load %arg3[%c0_5, %c0_6] : memref<8x1xf32, #tpu.memory_space<vmem>>, vector<8x1xf32>
    tpu.vector_store %arg3[%c0_5, %c0_6], %8 {strides = array<i32>} : memref<8x1xf32, #tpu.memory_space<vmem>>, vector<8x1xf32>,
    return
  }
}

</mosaic_0001>

<bundles_post_ra>
// kernel: tpu_custom_call.1
= control target key start
LH: loop header
LB: loop body
LE: loop exit
PB: predicated region body
PF: predicated region fallthrough
CT: control target
= control target key end

     0   :  { %9 = vsyncpa [#allocation4], 0  ;;  %s77_s15 = smov [#allocation3]   ;;  %s110_s0 = inlined_call_operand.hbm [shape: f32[8,32], index: 0, kind: input, shape index: {}]   ;;  %s111_s1 = inlined_call_operand.vmem [shape: f32[1,32], index: 1, kind: input, shape index: {}]   ;;  %s112_s2 = inlined_call_operand.<no memory space> [shape: f32[1,1], index: 2, kind: input, shape index: {}]   ;;  %s113_s3 = inlined_call_operand.vmem [shape: f32[8,1], index: 3, kind: output, shape index: {}]  }
   0x1   :  { %s15_s14 = sshll.u32 %s110_s0, 4  ;;  %s17_s16 = sshll.u32 %s77_s15, 4  ;;  %s16_s14 = int_to_ptr.hbm [resolvable:$true] %s15_s14  ;;  %s18_s16 = int_to_ptr.vmem [resolvable:$true] %s17_s16 }
   0x2   :  { %20 = dma.hbm_to_vmem [thread:$0]  %s16_s14, 128, %s18_s16, [#allocation4]  }
   0x3   :  { %75 = dma.done.wait [#allocation4], 128  }
   0x4   :  { %76 = vsyncadd [#allocation4], 4294967168  ;;  %v29_v0 = vld [vmem:[#allocation3] sm:$0xff]  ;;  %vm35_vm0 = vcmask 261120   ;;  %v40_v4 = vstv %s112_s2  ;;  %vm42_vm1 = vcmask 7168  }
   0x5   :  { %v50_v1 = vld [vmem:[%s111_s1] ss:$0 sm:$0xff] }
   0x6   :  { %v34_v2 = vmul.f32 %v50_v1, %v29_v0 }
   0x8   :  { %v36_v3 = vsel %vm35_vm0, %v34_v2, 0.0 }
   0x9   :  { %37 = vadd.xlane.f32.xlu0 %v36_v3 }
  0x7c   :  { %v38_v5 = vpop.xlane.xlu0 %37 }
  0x7d   :  { %v41_v6 = vadd.f32 %v40_v4, %v38_v5 }
  0x7f   :  { %43 = vst.msk [vmem:[%s113_s3] sm:$0xff] %vm42_vm1, %v41_v6 }
  0x80   :  { %48 = vsyncpa [#allocation4], 1 }

</bundles_post_ra>
